<compile_context>
chip_gen: v6e
topology: v6e:2x2x1
jax: 0.10.0
libtpu: 0.0.40
codegen_flags: <defaults>
</compile_context>

<pallas_src>
import jax
import jax.numpy as jnp
from jax.experimental import pallas as pl
from jax.experimental.pallas import tpu as pltpu

LANE = 128     # TPU vreg lane width: pad feature dims to multiples of this
SUBLANE = 8    # f32 sublane width: batch tiles are multiples of this


def _round_up(n, m):
    return ((n + m - 1) // m) * m


def decoder_kernel(z_ref, w1_ref, b1_ref, w2_ref, b2_ref, w3_ref, b3_ref, o_ref):
    # bf16 MXU inputs, f32 accumulation; f32 bias + ReLU epilogue on the VPU.
    z = z_ref[...].astype(jnp.bfloat16)
    h = jnp.dot(z, w1_ref[...], preferred_element_type=jnp.float32) + b1_ref[...]
    h = jnp.maximum(h, 0.0)
    h = jnp.dot(h.astype(jnp.bfloat16), w2_ref[...],
                preferred_element_type=jnp.float32) + b2_ref[...]
    h = jnp.maximum(h, 0.0)
    out = jnp.dot(h.astype(jnp.bfloat16), w3_ref[...],
                  preferred_element_type=jnp.float32) + b3_ref[...]
    # o_ref may be narrower than the padded matmul width: only the final
    # 128-wide column block is masked on store (no post-kernel slice pass).
    o_ref[...] = out[:, : o_ref.shape[1]].astype(o_ref.dtype)


def prepare_decoder_params(params):
    """One-time parameter prep (call at init, NOT per forward call).

    PyTorch-style (out, in) weights -> (in, out); hidden/output feature dims
    zero-padded to multiples of 128; weights cast to bf16; biases kept f32 and
    shaped (1, out_pad) for a cheap sublane broadcast inside the kernel.
    """
    d_in = params["w1"].shape[1]
    hidden = params["w1"].shape[0]
    d_out = params["w3"].shape[0]
    h_pad = _round_up(hidden, LANE)
    o_pad = _round_up(d_out, LANE)

    def pad_to(a, shape):
        return jnp.pad(a, [(0, s - d) for d, s in zip(a.shape, shape)])

    return {
        "w1": pad_to(params["w1"].T, (d_in, h_pad)).astype(jnp.bfloat16),
        "w2": pad_to(params["w2"].T, (h_pad, h_pad)).astype(jnp.bfloat16),
        "w3": pad_to(params["w3"].T, (h_pad, o_pad)).astype(jnp.bfloat16),
        "b1": pad_to(params["b1"][None, :], (1, h_pad)).astype(jnp.float32),
        "b2": pad_to(params["b2"][None, :], (1, h_pad)).astype(jnp.float32),
        "b3": pad_to(params["b3"][None, :], (1, o_pad)).astype(jnp.float32),
        "d_in": d_in,
        "d_out": d_out,
    }


def decoder_forward(z, prep, *, batch_tile=None):
    """z: (B, d_in) f32 (or bf16).  prep: prepare_decoder_params output.
    Returns (B, d_out) f32."""
    B, d_in = z.shape
    assert d_in == prep["d_in"], "latent dim mismatch"
    d_out = prep["d_out"]
    w1, b1 = prep["w1"], prep["b1"]
    w2, b2 = prep["w2"], prep["b2"]
    w3, b3 = prep["w3"], prep["b3"]
    h_pad = w1.shape[1]
    o_pad = w3.shape[1]

    # Batch tile selection:
    #   * tiny B: one tile rounded to the f32 sublane width
    #   * medium B: split into >=2 grid steps (multiples of 16 for bf16 MXU
    #     operands) so v7x megacore can shard the 'parallel' batch axis
    #   * large B: 512-wide tiles (near HBM roofline per measured sweeps)
    if batch_tile is None:
        if B <= 2 * SUBLANE:
            batch_tile = _round_up(B, SUBLANE)
        elif B <= 1024:
            batch_tile = _round_up(-(-B // 2), 16)
        else:
            batch_tile = 512
    tb = batch_tile
    grid = (pl.cdiv(B, tb),)

    # Explicit VMEM budget from the actual resident set: weights/biases
    # (x2 headroom for the non-single-buffered fallback), double-buffered
    # z/out tiles, plus f32 activation headroom. Clamped to a safe range.
    wbytes = sum(a.size * a.dtype.itemsize for a in (w1, b1, w2, b2, w3, b3))
    iobytes = 2 * tb * d_in * z.dtype.itemsize + 2 * tb * d_out * 4
    actbytes = 4 * tb * h_pad * 4
    vmem_limit = int(max(32 << 20,
                         min(96 << 20, 2 * wbytes + iobytes + actbytes + (8 << 20))))

    cost = pl.CostEstimate(
        flops=2 * B * (d_in * h_pad + h_pad * h_pad + h_pad * o_pad),
        transcendentals=0,
        bytes_accessed=z.size * z.dtype.itemsize + wbytes + B * d_out * 4,
    )

    def call(single_buffer_consts):
        if single_buffer_consts:
            # Constant-index blocks never change -> no need for double buffers.
            const_spec = lambda a: pl.BlockSpec(a.shape, lambda i: (0, 0),
                                                pipeline_mode=pl.Buffered(1))
        else:
            const_spec = lambda a: pl.BlockSpec(a.shape, lambda i: (0, 0))
        return pl.pallas_call(
            decoder_kernel,
            out_shape=jax.ShapeDtypeStruct((B, d_out), jnp.float32),
            grid=grid,
            in_specs=[
                pl.BlockSpec((tb, d_in), lambda i: (i, 0)),   # z: tiled over batch
                const_spec(w1), const_spec(b1),
                const_spec(w2), const_spec(b2),
                const_spec(w3), const_spec(b3),
            ],
            out_specs=pl.BlockSpec((tb, d_out), lambda i: (i, 0)),
            compiler_params=pltpu.CompilerParams(
                dimension_semantics=("parallel",),   # v7x: shard batch across 2 TCs
                vmem_limit_bytes=vmem_limit,
            ),
            cost_estimate=cost,
        )(z, w1, b1, w2, b2, w3, b3)

    try:
        return call(True)
    except Exception:
        # Fallback if Buffered(1) single-buffering is unsupported in this build.
        return call(False)


# ----------------------------- init + references -----------------------------

def xavier_uniform(key, out_dim, in_dim, gain=1.0):
    # Matches torch.nn.init.xavier_uniform_ for a (out, in) Linear weight.
    limit = gain * jnp.sqrt(6.0 / (in_dim + out_dim))
    return jax.random.uniform(
        key, (out_dim, in_dim), minval=-limit, maxval=limit, dtype=jnp.float32
    )


def init_decoder_params(key, layer_sizes):
    input_size = layer_sizes[0]
    hidden_size = layer_sizes[1]
    output_size = layer_sizes[-1]
    k1, k2, k3 = jax.random.split(key, 3)
    return {
        "w1": xavier_uniform(k1, hidden_size, input_size),
        "b1": jnp.zeros((hidden_size,), jnp.float32),
        "w2": xavier_uniform(k2, hidden_size, hidden_size),
        "b2": jnp.zeros((hidden_size,), jnp.float32),
        "w3": xavier_uniform(k3, output_size, hidden_size),
        "b3": jnp.zeros((output_size,), jnp.float32),
    }


def decoder_reference_f32(z, params):
    h = jnp.maximum(z @ params["w1"].T + params["b1"], 0.0)
    h = jnp.maximum(h @ params["w2"].T + params["b2"], 0.0)
    return h @ params["w3"].T + params["b3"]


def decoder_reference_bf16(z, params):
    # Same bf16-input / f32-accumulation casting policy as the kernel.
    def dot(a, w):
        return jnp.dot(a.astype(jnp.bfloat16), w.T.astype(jnp.bfloat16),
                       preferred_element_type=jnp.float32)
    h = jnp.maximum(dot(z, params["w1"]) + params["b1"], 0.0)
    h = jnp.maximum(dot(h, params["w2"]) + params["b2"], 0.0)
    return dot(h, params["w3"]) + params["b3"]


if __name__ == "__main__":
    key = jax.random.PRNGKey(0)
    layer_sizes = [16, 32, 64]   # [input (latent), hidden, output]
    batch = 8

    pkey, zkey = jax.random.split(key)
    params = init_decoder_params(pkey, layer_sizes)
    prepared = prepare_decoder_params(params)   # one-time prep, not per call
    z = jax.random.normal(zkey, (batch, layer_sizes[0]), dtype=jnp.float32)

    out = decoder_forward(z, prepared)
    out = jax.block_until_ready(out)

    assert out.shape == (batch, layer_sizes[-1])
    # Tight check vs a reference with the same bf16-MXU / f32-accum policy.
    ref_bf16 = decoder_reference_bf16(z, params)
    assert jnp.allclose(out, ref_bf16, atol=2e-3, rtol=2e-3), "mismatch vs bf16 reference"
    # Loose sanity check vs the pure-f32 PyTorch-semantics reference.
    # (bf16 weight cast intentionally deviates from f32 Linear parity.)
    ref_f32 = decoder_reference_f32(z, params)
    assert jnp.allclose(out, ref_f32, atol=1e-1, rtol=1e-1), "mismatch vs f32 reference"

    print("KERNEL_OK")
</pallas_src>

<mosaic_0001>
module attributes {stable_mosaic.version = 11 : i64} {
  func.func @decoder_kernel(%arg0: i32, %arg1: memref<8x16xf32, #tpu.memory_space<vmem>>, %arg2: memref<16x128xbf16, #tpu.memory_space<vmem>>, %arg3: memref<1x128xf32, #tpu.memory_space<vmem>>, %arg4: memref<128x128xbf16, #tpu.memory_space<vmem>>, %arg5: memref<1x128xf32, #tpu.memory_space<vmem>>, %arg6: memref<128x128xbf16, #tpu.memory_space<vmem>>, %arg7: memref<1x128xf32, #tpu.memory_space<vmem>>, %arg8: memref<8x64xf32, #tpu.memory_space<vmem>>) attributes {dimension_semantics = [#tpu.dimension_semantics<parallel>], iteration_bounds = array<i64: 1>, scalar_prefetch = 0 : i64, scratch_operands = 0 : i64, tpu.core_type = #tpu.core_type<tc>, window_params = [{transform_indices = @transform_0, window_bounds = array<i64: 8, 16>}, {pipeline_mode = #tpu.pipeline_mode<synchronous>, transform_indices = @transform_1, window_bounds = array<i64: 16, 128>}, {pipeline_mode = #tpu.pipeline_mode<synchronous>, transform_indices = @transform_2, window_bounds = array<i64: 1, 128>}, {pipeline_mode = #tpu.pipeline_mode<synchronous>, transform_indices = @transform_3, window_bounds = array<i64: 128, 128>}, {pipeline_mode = #tpu.pipeline_mode<synchronous>, transform_indices = @transform_4, window_bounds = array<i64: 1, 128>}, {pipeline_mode = #tpu.pipeline_mode<synchronous>, transform_indices = @transform_5, window_bounds = array<i64: 128, 128>}, {pipeline_mode = #tpu.pipeline_mode<synchronous>, transform_indices = @transform_6, window_bounds = array<i64: 1, 128>}, {transform_indices = @transform_7, window_bounds = array<i64: 8, 64>}]} {
    %c0 = arith.constant 0 : index
    %c0_0 = arith.constant 0 : index
    %0 = vector.load %arg1[%c0, %c0_0] : memref<8x16xf32, #tpu.memory_space<vmem>>, vector<8x16xf32>
    %1 = arith.truncf %0 : vector<8x16xf32> to vector<8x16xbf16>
    %c0_1 = arith.constant 0 : index
    %c0_2 = arith.constant 0 : index
    %2 = vector.load %arg2[%c0_1, %c0_2] : memref<16x128xbf16, #tpu.memory_space<vmem>>, vector<16x128xbf16>
    %cst = arith.constant dense<0.000000e+00> : vector<8x128xf32>
    %3 = tpu.matmul %1, %2, %cst {dimension_numbers = #tpu.dot_dimension_numbers<[1], [0], [0], [1], [0, 0, 1, 1], [], []>} : vector<8x16xbf16>, vector<16x128xbf16>, vector<8x128xf32> -> vector<8x128xf32>
    %c0_3 = arith.constant 0 : index
    %c0_4 = arith.constant 0 : index
    %4 = vector.load %arg3[%c0_3, %c0_4] : memref<1x128xf32, #tpu.memory_space<vmem>>, vector<1x128xf32>
    %5 = vector.broadcast %4 : vector<1x128xf32> to vector<8x128xf32>
    %6 = arith.addf %3, %5 : vector<8x128xf32>
    %cst_5 = arith.constant 0.000000e+00 : f32
    %7 = vector.broadcast %cst_5 : f32 to vector<8x128xf32>
    %8 = arith.maximumf %6, %7 : vector<8x128xf32>
    %9 = arith.truncf %8 : vector<8x128xf32> to vector<8x128xbf16>
    %c0_6 = arith.constant 0 : index
    %c0_7 = arith.constant 0 : index
    %10 = vector.load %arg4[%c0_6, %c0_7] : memref<128x128xbf16, #tpu.memory_space<vmem>>, vector<128x128xbf16>
    %cst_8 = arith.constant dense<0.000000e+00> : vector<8x128xf32>
    %11 = tpu.matmul %9, %10, %cst_8 {dimension_numbers = #tpu.dot_dimension_numbers<[1], [0], [0], [1], [0, 0, 1, 1], [], []>} : vector<8x128xbf16>, vector<128x128xbf16>, vector<8x128xf32> -> vector<8x128xf32>
    %c0_9 = arith.constant 0 : index
    %c0_10 = arith.constant 0 : index
    %12 = vector.load %arg5[%c0_9, %c0_10] : memref<1x128xf32, #tpu.memory_space<vmem>>, vector<1x128xf32>
    %13 = vector.broadcast %12 : vector<1x128xf32> to vector<8x128xf32>
    %14 = arith.addf %11, %13 : vector<8x128xf32>
    %cst_11 = arith.constant 0.000000e+00 : f32
    %15 = vector.broadcast %cst_11 : f32 to vector<8x128xf32>
    %16 = arith.maximumf %14, %15 : vector<8x128xf32>
    %17 = arith.truncf %16 : vector<8x128xf32> to vector<8x128xbf16>
    %c0_12 = arith.constant 0 : index
    %c0_13 = arith.constant 0 : index
    %18 = vector.load %arg6[%c0_12, %c0_13] : memref<128x128xbf16, #tpu.memory_space<vmem>>, vector<128x128xbf16>
    %cst_14 = arith.constant dense<0.000000e+00> : vector<8x128xf32>
    %19 = tpu.matmul %17, %18, %cst_14 {dimension_numbers = #tpu.dot_dimension_numbers<[1], [0], [0], [1], [0, 0, 1, 1], [], []>} : vector<8x128xbf16>, vector<128x128xbf16>, vector<8x128xf32> -> vector<8x128xf32>
    %c0_15 = arith.constant 0 : index
    %c0_16 = arith.constant 0 : index
    %20 = vector.load %arg7[%c0_15, %c0_16] : memref<1x128xf32, #tpu.memory_space<vmem>>, vector<1x128xf32>
    %21 = vector.broadcast %20 : vector<1x128xf32> to vector<8x128xf32>
    %22 = arith.addf %19, %21 : vector<8x128xf32>
    %23 = vector.extract_strided_slice %22 {offsets = [0, 0], sizes = [8, 64], strides = [1, 1]} : vector<8x128xf32> to vector<8x64xf32>
    %c0_17 = arith.constant 0 : index
    %c0_18 = arith.constant 0 : index
    %24 = vector.load %arg8[%c0_17, %c0_18] : memref<8x64xf32, #tpu.memory_space<vmem>>, vector<8x64xf32>
    tpu.vector_store %arg8[%c0_17, %c0_18], %23 {strides = array<i32>} : memref<8x64xf32, #tpu.memory_space<vmem>>, vector<8x64xf32>,
    return
  }
  func.func @transform_0(%arg0: i32) -> (i32, i32) {
    %c0_i32 = arith.constant 0 : i32
    %c0_i32_0 = arith.constant 0 : i32
    return %arg0, %c0_i32 : i32, i32
  }
  func.func @transform_1(%arg0: i32) -> (i32, i32) {
    %c0_i32 = arith.constant 0 : i32
    %c0_i32_0 = arith.constant 0 : i32
    %c0_i32_1 = arith.constant 0 : i32
    return %c0_i32, %c0_i32_0 : i32, i32
  }
  func.func @transform_2(%arg0: i32) -> (i32, i32) {
    %c0_i32 = arith.constant 0 : i32
    %c0_i32_0 = arith.constant 0 : i32
    %c0_i32_1 = arith.constant 0 : i32
    return %c0_i32, %c0_i32_0 : i32, i32
  }
  func.func @transform_3(%arg0: i32) -> (i32, i32) {
    %c0_i32 = arith.constant 0 : i32
    %c0_i32_0 = arith.constant 0 : i32
    %c0_i32_1 = arith.constant 0 : i32
    return %c0_i32, %c0_i32_0 : i32, i32
  }
  func.func @transform_4(%arg0: i32) -> (i32, i32) {
    %c0_i32 = arith.constant 0 : i32
    %c0_i32_0 = arith.constant 0 : i32
    %c0_i32_1 = arith.constant 0 : i32
    return %c0_i32, %c0_i32_0 : i32, i32
  }
  func.func @transform_5(%arg0: i32) -> (i32, i32) {
    %c0_i32 = arith.constant 0 : i32
    %c0_i32_0 = arith.constant 0 : i32
    %c0_i32_1 = arith.constant 0 : i32
    return %c0_i32, %c0_i32_0 : i32, i32
  }
  func.func @transform_6(%arg0: i32) -> (i32, i32) {
    %c0_i32 = arith.constant 0 : i32
    %c0_i32_0 = arith.constant 0 : i32
    %c0_i32_1 = arith.constant 0 : i32
    return %c0_i32, %c0_i32_0 : i32, i32
  }
  func.func @transform_7(%arg0: i32) -> (i32, i32) {
    %c0_i32 = arith.constant 0 : i32
    %c0_i32_0 = arith.constant 0 : i32
    return %arg0, %c0_i32 : i32, i32
  }
}

module attributes {stable_mosaic.version = 11 : i64} {
  func.func @decoder_kernel(%arg0: i32, %arg1: memref<8x16xf32, #tpu.memory_space<vmem>>, %arg2: memref<16x128xbf16, #tpu.memory_space<vmem>>, %arg3: memref<1x128xf32, #tpu.memory_space<vmem>>, %arg4: memref<128x128xbf16, #tpu.memory_space<vmem>>, %arg5: memref<1x128xf32, #tpu.memory_space<vmem>>, %arg6: memref<128x128xbf16, #tpu.memory_space<vmem>>, %arg7: memref<1x128xf32, #tpu.memory_space<vmem>>, %arg8: memref<8x64xf32, #tpu.memory_space<vmem>>) attributes {dimension_semantics = [#tpu.dimension_semantics<parallel>], iteration_bounds = array<i64: 1>, scalar_prefetch = 0 : i64, scratch_operands = 0 : i64, tpu.core_type = #tpu.core_type<tc>, window_params = [{transform_indices = @transform_0, window_bounds = array<i64: 8, 16>}, {pipeline_mode = #tpu.pipeline_mode<synchronous>, transform_indices = @transform_1, window_bounds = array<i64: 16, 128>}, {pipeline_mode = #tpu.pipeline_mode<synchronous>, transform_indices = @transform_2, window_bounds = array<i64: 1, 128>}, {pipeline_mode = #tpu.pipeline_mode<synchronous>, transform_indices = @transform_3, window_bounds = array<i64: 128, 128>}, {pipeline_mode = #tpu.pipeline_mode<synchronous>, transform_indices = @transform_4, window_bounds = array<i64: 1, 128>}, {pipeline_mode = #tpu.pipeline_mode<synchronous>, transform_indices = @transform_5, window_bounds = array<i64: 128, 128>}, {pipeline_mode = #tpu.pipeline_mode<synchronous>, transform_indices = @transform_6, window_bounds = array<i64: 1, 128>}, {transform_indices = @transform_7, window_bounds = array<i64: 8, 64>}]} {
    %c0 = arith.constant 0 : index
    %c0_0 = arith.constant 0 : index
    %0 = vector.load %arg1[%c0, %c0_0] : memref<8x16xf32, #tpu.memory_space<vmem>>, vector<8x16xf32>
    %1 = arith.truncf %0 : vector<8x16xf32> to vector<8x16xbf16>
    %c0_1 = arith.constant 0 : index
    %c0_2 = arith.constant 0 : index
    %2 = vector.load %arg2[%c0_1, %c0_2] : memref<16x128xbf16, #tpu.memory_space<vmem>>, vector<16x128xbf16>
    %cst = arith.constant dense<0.000000e+00> : vector<8x128xf32>
    %3 = tpu.matmul %1, %2, %cst {dimension_numbers = #tpu.dot_dimension_numbers<[1], [0], [0], [1], [0, 0, 1, 1], [], []>} : vector<8x16xbf16>, vector<16x128xbf16>, vector<8x128xf32> -> vector<8x128xf32>
    %c0_3 = arith.constant 0 : index
    %c0_4 = arith.constant 0 : index
    %4 = vector.load %arg3[%c0_3, %c0_4] : memref<1x128xf32, #tpu.memory_space<vmem>>, vector<1x128xf32>
    %5 = vector.broadcast %4 : vector<1x128xf32> to vector<8x128xf32>
    %6 = arith.addf %3, %5 : vector<8x128xf32>
    %cst_5 = arith.constant 0.000000e+00 : f32
    %7 = vector.broadcast %cst_5 : f32 to vector<8x128xf32>
    %8 = arith.maximumf %6, %7 : vector<8x128xf32>
    %9 = arith.truncf %8 : vector<8x128xf32> to vector<8x128xbf16>
    %c0_6 = arith.constant 0 : index
    %c0_7 = arith.constant 0 : index
    %10 = vector.load %arg4[%c0_6, %c0_7] : memref<128x128xbf16, #tpu.memory_space<vmem>>, vector<128x128xbf16>
    %cst_8 = arith.constant dense<0.000000e+00> : vector<8x128xf32>
    %11 = tpu.matmul %9, %10, %cst_8 {dimension_numbers = #tpu.dot_dimension_numbers<[1], [0], [0], [1], [0, 0, 1, 1], [], []>} : vector<8x128xbf16>, vector<128x128xbf16>, vector<8x128xf32> -> vector<8x128xf32>
    %c0_9 = arith.constant 0 : index
    %c0_10 = arith.constant 0 : index
    %12 = vector.load %arg5[%c0_9, %c0_10] : memref<1x128xf32, #tpu.memory_space<vmem>>, vector<1x128xf32>
    %13 = vector.broadcast %12 : vector<1x128xf32> to vector<8x128xf32>
    %14 = arith.addf %11, %13 : vector<8x128xf32>
    %cst_11 = arith.constant 0.000000e+00 : f32
    %15 = vector.broadcast %cst_11 : f32 to vector<8x128xf32>
    %16 = arith.maximumf %14, %15 : vector<8x128xf32>
    %17 = arith.truncf %16 : vector<8x128xf32> to vector<8x128xbf16>
    %c0_12 = arith.constant 0 : index
    %c0_13 = arith.constant 0 : index
    %18 = vector.load %arg6[%c0_12, %c0_13] : memref<128x128xbf16, #tpu.memory_space<vmem>>, vector<128x128xbf16>
    %cst_14 = arith.constant dense<0.000000e+00> : vector<8x128xf32>
    %19 = tpu.matmul %17, %18, %cst_14 {dimension_numbers = #tpu.dot_dimension_numbers<[1], [0], [0], [1], [0, 0, 1, 1], [], []>} : vector<8x128xbf16>, vector<128x128xbf16>, vector<8x128xf32> -> vector<8x128xf32>
    %c0_15 = arith.constant 0 : index
    %c0_16 = arith.constant 0 : index
    %20 = vector.load %arg7[%c0_15, %c0_16] : memref<1x128xf32, #tpu.memory_space<vmem>>, vector<1x128xf32>
    %21 = vector.broadcast %20 : vector<1x128xf32> to vector<8x128xf32>
    %22 = arith.addf %19, %21 : vector<8x128xf32>
    %23 = vector.extract_strided_slice %22 {offsets = [0, 0], sizes = [8, 64], strides = [1, 1]} : vector<8x128xf32> to vector<8x64xf32>
    %c0_17 = arith.constant 0 : index
    %c0_18 = arith.constant 0 : index
    %24 = vector.load %arg8[%c0_17, %c0_18] : memref<8x64xf32, #tpu.memory_space<vmem>>, vector<8x64xf32>
    tpu.vector_store %arg8[%c0_17, %c0_18], %23 {strides = array<i32>} : memref<8x64xf32, #tpu.memory_space<vmem>>, vector<8x64xf32>,
    return
  }
  func.func @transform_0(%arg0: i32) -> (i32, i32) {
    %c0_i32 = arith.constant 0 : i32
    %c0_i32_0 = arith.constant 0 : i32
    return %arg0, %c0_i32 : i32, i32
  }
  func.func @transform_1(%arg0: i32) -> (i32, i32) {
    %c0_i32 = arith.constant 0 : i32
    %c0_i32_0 = arith.constant 0 : i32
    %c0_i32_1 = arith.constant 0 : i32
    return %c0_i32, %c0_i32_0 : i32, i32
  }
  func.func @transform_2(%arg0: i32) -> (i32, i32) {
    %c0_i32 = arith.constant 0 : i32
    %c0_i32_0 = arith.constant 0 : i32
    %c0_i32_1 = arith.constant 0 : i32
    return %c0_i32, %c0_i32_0 : i32, i32
  }
  func.func @transform_3(%arg0: i32) -> (i32, i32) {
    %c0_i32 = arith.constant 0 : i32
    %c0_i32_0 = arith.constant 0 : i32
    %c0_i32_1 = arith.constant 0 : i32
    return %c0_i32, %c0_i32_0 : i32, i32
  }
  func.func @transform_4(%arg0: i32) -> (i32, i32) {
    %c0_i32 = arith.constant 0 : i32
    %c0_i32_0 = arith.constant 0 : i32
    %c0_i32_1 = arith.constant 0 : i32
    return %c0_i32, %c0_i32_0 : i32, i32
  }
  func.func @transform_5(%arg0: i32) -> (i32, i32) {
    %c0_i32 = arith.constant 0 : i32
    %c0_i32_0 = arith.constant 0 : i32
    %c0_i32_1 = arith.constant 0 : i32
    return %c0_i32, %c0_i32_0 : i32, i32
  }
  func.func @transform_6(%arg0: i32) -> (i32, i32) {
    %c0_i32 = arith.constant 0 : i32
    %c0_i32_0 = arith.constant 0 : i32
    %c0_i32_1 = arith.constant 0 : i32
    return %c0_i32, %c0_i32_0 : i32, i32
  }
  func.func @transform_7(%arg0: i32) -> (i32, i32) {
    %c0_i32 = arith.constant 0 : i32
    %c0_i32_0 = arith.constant 0 : i32
    return %arg0, %c0_i32 : i32, i32
  }
}

</mosaic_0001>

<bundles_post_ra>
// kernel: tpu_custom_call.1
= control target key start
LH: loop header
LB: loop body
LE: loop exit
PB: predicated region body
PF: predicated region fallthrough
CT: control target
= control target key end

     0   :  { %12 = vsyncpa [#allocation3], 0  ;;  %s710_s0 = inlined_call_operand.hbm [shape: f32[8,16], index: 0, kind: input, shape index: {}]   ;;  %s711_s1 = inlined_call_operand.hbm [shape: bf16[16,128], index: 1, kind: input, shape index: {}]   ;;  %s712_s2 = inlined_call_operand.vmem [shape: f32[1,128], index: 2, kind: input, shape index: {}]   ;;  %s713_s3 = inlined_call_operand.hbm [shape: bf16[128,128], index: 3, kind: input, shape index: {}]   ;;  %s714_s4 = inlined_call_operand.vmem [shape: f32[1,128], index: 4, kind: input, shape index: {}]   ;;  %s715_s5 = inlined_call_operand.hbm [shape: bf16[128,128], index: 5, kind: input, shape index: {}]   ;;  %s716_s6 = inlined_call_operand.vmem [shape: f32[1,128], index: 6, kind: input, shape index: {}]   ;;  %s717_s7 = inlined_call_operand.hbm [shape: f32[8,64], index: 7, kind: output, shape index: {}]  }
   0x1   :  { %13 = vsyncpa [#allocation6], 0 }
   0x2   :  { %14 = vsyncpa [#allocation9], 0 }
   0x3   :  { %15 = vsyncpa [#allocation4], 0  ;;  %s608_s24 = smov [#allocation5]  }
   0x4   :  { %s31_s25 = sshll.u32 %s608_s24, 4  ;;  %s32_s25 = int_to_ptr.vmem [resolvable:$true] %s31_s25 }
   0x5   :  { %s508_s26 = scalar_lea.vmem %s32_s25, 128  ;;  %p513_p1 = scmp.lt.s32.totalorder %s32_s25, %s32_s25 }
   0x6   :  { %p509_p0 = scmp.ne.s32.totalorder %s32_s25, %s508_s26  ;;  %p514_p2 = scmp.lt.s32.totalorder %s508_s26, %s508_s26 }
   0x8   :  { %p515_p3 = por %p514_p2, %p513_p1 }
   0xa   :  { %p516_p4 = pnand %p515_p3, %p509_p0 }
   0xc   :  { %519 = shalt.err (!%p516_p4)
}
   0xd   :  { %s609_s27 = smov 64   ;;  %s610_s28 = smov 4  }
   0xe   :  { %37 = dma.hbm_to_vmem [thread:$0]  %s711_s1, 128, %s32_s25, [#allocation6], %s609_s27, %s609_s27, %s610_s28  }
   0xf   :  { %s611_s8 = smov [#allocation2]   ;;  %s612_s10 = smov [#allocation7]  }
  0x10   :  { %s22_s9 = sshll.u32 %s611_s8, 4  ;;  %s45_s11 = sshll.u32 %s612_s10, 4  ;;  %s23_s9 = int_to_ptr.vmem [resolvable:$true] %s22_s9  ;;  %s46_s11 = int_to_ptr.vmem [resolvable:$true] %s45_s11 }
  0x11   :  { %s528_s12 = scalar_lea.vmem %s23_s9, 128  ;;  %p533_p6 = scmp.lt.s32.totalorder %s23_s9, %s23_s9 }
  0x12   :  { %p529_p5 = scmp.ne.s32.totalorder %s23_s9, %s528_s12  ;;  %p534_p7 = scmp.lt.s32.totalorder %s528_s12, %s528_s12 }
  0x14   :  { %p535_p8 = por %p534_p7, %p533_p6 }
  0x16   :  { %p536_p9 = pnand %p535_p8, %p529_p5 }
  0x18   :  { %539 = shalt.err (!%p536_p9)
}
  0x19   :  { %25 = dma.hbm_to_vmem [thread:$0]  %s710_s0, 128, %s23_s9, [#allocation3]  }
  0x1a   :  { %s548_s15 = scalar_lea.vmem %s46_s11, 1024  ;;  %p553_p11 = scmp.lt.s32.totalorder %s46_s11, %s46_s11 }
  0x1b   :  { %p549_p10 = scmp.ne.s32.totalorder %s46_s11, %s548_s15  ;;  %p554_p12 = scmp.lt.s32.totalorder %s548_s15, %s548_s15 }
  0x1d   :  { %p555_p13 = por %p554_p12, %p553_p11 }
  0x1f   :  { %p556_p0 = pnand %p555_p13, %p549_p10 }
  0x21   :  { %559 = shalt.err (!%p556_p0)
}
  0x22   :  { %51 = dma.hbm_to_vmem [thread:$0]  %s713_s3, 1024, %s46_s11, [#allocation6], %s609_s27, %s609_s27, %s610_s28  }
  0x23   :  { %s613_s17 = smov [#allocation8]  }
  0x24   :  { %s59_s18 = sshll.u32 %s613_s17, 4  ;;  %s60_s18 = int_to_ptr.vmem [resolvable:$true] %s59_s18 }
  0x25   :  { %s568_s19 = scalar_lea.vmem %s60_s18, 1024  ;;  %p573_p2 = scmp.lt.s32.totalorder %s60_s18, %s60_s18 }
  0x26   :  { %p569_p1 = scmp.ne.s32.totalorder %s60_s18, %s568_s19  ;;  %p574_p3 = scmp.lt.s32.totalorder %s568_s19, %s568_s19 }
  0x28   :  { %p575_p4 = por %p574_p3, %p573_p2 }
  0x2a   :  { %p576_p5 = pnand %p575_p4, %p569_p1 }
  0x2c   :  { %579 = shalt.err (!%p576_p5)
}
  0x2d   :  { %65 = dma.hbm_to_vmem [thread:$0]  %s715_s5, 1024, %s60_s18, [#allocation9], %s609_s27, %s609_s27, %s610_s28  }
  0x2e   :  { %600 = dma.done.wait [#allocation3], 128  }
  0x2f   :  { %601 = vsyncadd [#allocation3], 4294967168 }
  0x30   :  { %602 = dma.done.wait [#allocation6], 1152  }
  0x31   :  { %603 = vsyncadd [#allocation6], 4294966144 }
  0x32   :  { %604 = dma.done.wait [#allocation9], 1024  }
  0x33   :  { %605 = vsyncadd [#allocation9], 4294966272  ;;  %v614_v0 = vmov 0.0   ;;  %vm615_vm0 = vmmov 0   ;;  %v483_v1 = vld [vmem:[#allocation5] sm:$0xff]   ;;  %v81_v2 = vld [vmem:[#allocation2] sm:$0xff] }
  0x34   :  { %428 = vmatprep.subr.bf16.mxu0 %v614_v0  ;;  %430 = vmatprep.mubr.msk.bf16.mxu0 %vm615_vm0, %v614_v0  ;;  %v82_v3 = vpack.c.bf16 %v81_v2, %v81_v2  ;;  %vm98_vm1 = vcmask 130048   ;;  %v484_v4 = vld [vmem:[#allocation7 + $0x38] sm:$0xff]   ;;  %v485_v5 = vld [vmem:[#allocation7 + $0x30] sm:$0xff]   ;;  %v486_v6 = vld [vmem:[#allocation7 + $0x28] sm:$0xff]   ;;  %s616_s24 = smov [#allocation10]   ;;  %vm368_vm2 = vcmask 523264  }
  0x35   :  { %434 = vmatprep.subr.bf16.mxu1 %v614_v0  ;;  %450 = vmatprep.mubr.msk.bf16.mxu1 %vm615_vm0, %v614_v0  ;;  %v487_v7 = vld [vmem:[#allocation7 + $0x20] sm:$0xff]   ;;  %v488_v8 = vld [vmem:[#allocation7 + $0x18] sm:$0xff]   ;;  %v489_v9 = vld [vmem:[#allocation7 + $0x10] sm:$0xff]   ;;  %s376_s25 = sshll.u32 %s616_s24, 4  ;;  %s377_s25 = int_to_ptr.vmem [resolvable:$true] %s376_s25 }
  0x36   :  { %429 = vmatpush3.bf16.msra.mxu0 %v483_v1  ;;  %435 = vmatpush3.bf16.msra.mxu1 %v484_v4  ;;  %v490_v10 = vld [vmem:[#allocation7 + $0x8] sm:$0xff]   ;;  %v491_v11 = vld [vmem:[#allocation7] sm:$0xff]   ;;  %v492_v12 = vld [vmem:[#allocation8 + $0x38] sm:$0xff]   ;;  %p585_p7 = scmp.lt.s32.totalorder %s377_s25, %s377_s25 }
  0x37   :  { %454 = vmatprep.subr.bf16.mxu0 %v614_v0  ;;  %436 = vmatprep.subr.bf16.mxu1 %v614_v0  ;;  %v493_v13 = vld [vmem:[#allocation8 + $0x30] sm:$0xff]   ;;  %v494_v14 = vld [vmem:[#allocation8 + $0x28] sm:$0xff]   ;;  %v495_v15 = vld [vmem:[#allocation8 + $0x20] sm:$0xff]  }
  0x38   :  { %v496_v16 = vld [vmem:[#allocation8 + $0x18] sm:$0xff]   ;;  %v497_v17 = vld [vmem:[#allocation8 + $0x10] sm:$0xff]   ;;  %v498_v26 = vld [vmem:[#allocation8 + $0x8] sm:$0xff]  }
  0x39   :  { %431 = vmatmul.mubr.msk.bf16.vlgmr.msra.gmra.mxu0 %vm98_vm1, %v82_v3  ;;  %v387_v18 = vld [vmem:[%s712_s2] ss:$0 sm:$0xff]  ;;  %v499_v27 = vld [vmem:[#allocation8] sm:$0xff]  }
  0x3a   :  { %470 = vmatprep.mubr.msk.bf16.mxu0 %vm615_vm0, %v614_v0  ;;  %437 = vmatpush3.bf16.msra.mxu1 %v485_v5  ;;  %v390_v28 = vld [vmem:[%s714_s4] ss:$0 sm:$0xff]  ;;  %s580_s4 = scalar_lea.vmem %s377_s25, 128 }
  0x3b   :  { %438 = vmatprep.subr.bf16.mxu1 %v614_v0  ;;  %455 = vmatpush3.bf16.msra.mxu0 %v492_v12  ;;  %v399_v36 = vld [vmem:[%s716_s6] ss:$0 sm:$0xff]  ;;  %p581_p6 = scmp.ne.s32.totalorder %s377_s25, %s580_s4  ;;  %p586_p8 = scmp.lt.s32.totalorder %s580_s4, %s580_s4 }
  0x3c   :  { %456 = vmatprep.subr.bf16.mxu0 %v614_v0 }
  0x3d   :  { %p587_p9 = por %p586_p8, %p585_p7 }
  0x3e   :  { %439 = vmatpush3.bf16.msra.mxu1 %v486_v6 }
  0x3f   :  { %440 = vmatprep.subr.bf16.mxu1 %v614_v0  ;;  %457 = vmatpush3.bf16.msra.mxu0 %v493_v13  ;;  %p588_p10 = pnand %p587_p9, %p581_p6 }
  0x40   :  { %458 = vmatprep.subr.bf16.mxu0 %v614_v0 }
  0x42   :  { %441 = vmatpush3.bf16.msra.mxu1 %v487_v7 }
  0x43   :  { %442 = vmatprep.subr.bf16.mxu1 %v614_v0  ;;  %459 = vmatpush3.bf16.msra.mxu0 %v494_v14 }
  0x44   :  { %460 = vmatprep.subr.bf16.mxu0 %v614_v0 }
  0x46   :  { %443 = vmatpush3.bf16.msra.mxu1 %v488_v8 }
  0x47   :  { %444 = vmatprep.subr.bf16.mxu1 %v614_v0  ;;  %461 = vmatpush3.bf16.msra.mxu0 %v495_v15 }
  0x48   :  { %462 = vmatprep.subr.bf16.mxu0 %v614_v0 }
  0x4a   :  { %445 = vmatpush3.bf16.msra.mxu1 %v489_v9 }
  0x4b   :  { %446 = vmatprep.subr.bf16.mxu1 %v614_v0  ;;  %463 = vmatpush3.bf16.msra.mxu0 %v496_v16 }
  0x4c   :  { %464 = vmatprep.subr.bf16.mxu0 %v614_v0 }
  0x4e   :  { %447 = vmatpush3.bf16.msra.mxu1 %v490_v10 }
  0x4f   :  { %448 = vmatprep.subr.bf16.mxu1 %v614_v0  ;;  %465 = vmatpush3.bf16.msra.mxu0 %v497_v17 }
  0x50   :  { %466 = vmatprep.subr.bf16.mxu0 %v614_v0 }
  0x52   :  { %449 = vmatpush3.bf16.msra.mxu1 %v491_v11 }
  0x53   :  { %467 = vmatpush3.bf16.msra.mxu0 %v498_v26 }
  0x54   :  { %468 = vmatprep.subr.bf16.mxu0 %v614_v0 }
  0x57   :  { %469 = vmatpush3.bf16.msra.mxu0 %v499_v27 }
  0xf9   :  { %v136_v19 = vpop.f32.mrf.mxu0 }
  0xfa   :  { %v137_v20 = vadd.f32 %v387_v18, %v136_v19 }
  0xfb   :  { %v432_v21 = vpop.f32.mrf.mxu0 }
  0xfc   :  { %v142_v22 = vmax.f32 %v137_v20, 0.0 }
  0xfd   :  { %v139_v23 = vpop.f32.mrf.mxu0 }
  0xfe   :  { %v143_v24 = vpack.c.bf16 %v142_v22, %v142_v22 }
  0xff   :  { %v433_v25 = vpop.f32.mrf.mxu0 }
 0x100   :  { %451 = vmatmul.mubr.bf16.vlgmr.msra.gmra.mxu1 %v143_v24 }
 0x1c0   :  { %v249_v29 = vpop.f32.mrf.mxu1 }
 0x1c1   :  { %v250_v30 = vadd.f32 %v390_v28, %v249_v29 }
 0x1c2   :  { %v452_v31 = vpop.f32.mrf.mxu1 }
 0x1c3   :  { %v255_v32 = vmax.f32 %v250_v30, 0.0 }
 0x1c4   :  { %v252_v33 = vpop.f32.mrf.mxu1 }
 0x1c5   :  { %v256_v34 = vpack.c.bf16 %v255_v32, %v255_v32 }
 0x1c6   :  { %v453_v35 = vpop.f32.mrf.mxu1 }
 0x1c7   :  { %471 = vmatmul.mubr.bf16.vlgmr.msra.gmra.mxu0 %v256_v34 }
 0x287   :  { %v362_v37 = vpop.f32.mrf.mxu0 }
 0x288   :  { %v363_v38 = vadd.f32 %v399_v36, %v362_v37 }
 0x289   :  { %v472_v39 = vpop.f32.mrf.mxu0 }
 0x28a   :  { %369 = vst.msk [vmem:[#allocation10] sm:$0xff] %vm368_vm2, %v363_v38 }
 0x28b   :  { %v365_v40 = vpop.f32.mrf.mxu0 }
 0x28c   :  { %591 = shalt.err (!%p588_p10)
}
 0x28d   :  { %379 = dma.vmem_to_hbm [thread:$0]  %s377_s25, 128, %s717_s7, [#allocation4]   ;;  %v473_v41 = vpop.f32.mrf.mxu0 }
 0x28e   :  { %606 = dma.done.wait [#allocation4], 128  }
 0x28f   :  { %607 = vsyncadd [#allocation4], 4294967168 }
 0x290   :  { %383 = vsyncpa [#allocation3], 1 }
 0x291   :  { %384 = vsyncpa [#allocation6], 1 }
 0x292   :  { %385 = vsyncpa [#allocation9], 1 }
 0x293   :  { %386 = vsyncpa [#allocation4], 1 }

// kernel: tpu_custom_call.1
= control target key start
LH: loop header
LB: loop body
LE: loop exit
PB: predicated region body
PF: predicated region fallthrough
CT: control target
= control target key end

     0   :  { %12 = vsyncpa [#allocation3], 0  ;;  %s710_s0 = inlined_call_operand.hbm [shape: f32[8,16], index: 0, kind: input, shape index: {}]   ;;  %s711_s1 = inlined_call_operand.hbm [shape: bf16[16,128], index: 1, kind: input, shape index: {}]   ;;  %s712_s2 = inlined_call_operand.vmem [shape: f32[1,128], index: 2, kind: input, shape index: {}]   ;;  %s713_s3 = inlined_call_operand.hbm [shape: bf16[128,128], index: 3, kind: input, shape index: {}]   ;;  %s714_s4 = inlined_call_operand.vmem [shape: f32[1,128], index: 4, kind: input, shape index: {}]   ;;  %s715_s5 = inlined_call_operand.hbm [shape: bf16[128,128], index: 5, kind: input, shape index: {}]   ;;  %s716_s6 = inlined_call_operand.vmem [shape: f32[1,128], index: 6, kind: input, shape index: {}]   ;;  %s717_s7 = inlined_call_operand.hbm [shape: f32[8,64], index: 7, kind: output, shape index: {}]  }
   0x1   :  { %13 = vsyncpa [#allocation6], 0 }
   0x2   :  { %14 = vsyncpa [#allocation9], 0 }
   0x3   :  { %15 = vsyncpa [#allocation4], 0  ;;  %s608_s24 = smov [#allocation5]  }
   0x4   :  { %s31_s25 = sshll.u32 %s608_s24, 4  ;;  %s32_s25 = int_to_ptr.vmem [resolvable:$true] %s31_s25 }
   0x5   :  { %s508_s26 = scalar_lea.vmem %s32_s25, 128  ;;  %p513_p1 = scmp.lt.s32.totalorder %s32_s25, %s32_s25 }
   0x6   :  { %p509_p0 = scmp.ne.s32.totalorder %s32_s25, %s508_s26  ;;  %p514_p2 = scmp.lt.s32.totalorder %s508_s26, %s508_s26 }
   0x8   :  { %p515_p3 = por %p514_p2, %p513_p1 }
   0xa   :  { %p516_p4 = pnand %p515_p3, %p509_p0 }
   0xc   :  { %519 = shalt.err (!%p516_p4)
}
   0xd   :  { %s609_s27 = smov 64   ;;  %s610_s28 = smov 4  }
   0xe   :  { %37 = dma.hbm_to_vmem [thread:$0]  %s711_s1, 128, %s32_s25, [#allocation6], %s609_s27, %s609_s27, %s610_s28  }
   0xf   :  { %s611_s8 = smov [#allocation2]   ;;  %s612_s10 = smov [#allocation7]  }
  0x10   :  { %s22_s9 = sshll.u32 %s611_s8, 4  ;;  %s45_s11 = sshll.u32 %s612_s10, 4  ;;  %s23_s9 = int_to_ptr.vmem [resolvable:$true] %s22_s9  ;;  %s46_s11 = int_to_ptr.vmem [resolvable:$true] %s45_s11 }
  0x11   :  { %s528_s12 = scalar_lea.vmem %s23_s9, 128  ;;  %p533_p6 = scmp.lt.s32.totalorder %s23_s9, %s23_s9 }
  0x12   :  { %p529_p5 = scmp.ne.s32.totalorder %s23_s9, %s528_s12  ;;  %p534_p7 = scmp.lt.s32.totalorder %s528_s12, %s528_s12 }
  0x14   :  { %p535_p8 = por %p534_p7, %p533_p6 }
  0x16   :  { %p536_p9 = pnand %p535_p8, %p529_p5 }
  0x18   :  { %539 = shalt.err (!%p536_p9)
}
  0x19   :  { %25 = dma.hbm_to_vmem [thread:$0]  %s710_s0, 128, %s23_s9, [#allocation3]  }
  0x1a   :  { %s548_s15 = scalar_lea.vmem %s46_s11, 1024  ;;  %p553_p11 = scmp.lt.s32.totalorder %s46_s11, %s46_s11 }
  0x1b   :  { %p549_p10 = scmp.ne.s32.totalorder %s46_s11, %s548_s15  ;;  %p554_p12 = scmp.lt.s32.totalorder %s548_s15, %s548_s15 }
  0x1d   :  { %p555_p13 = por %p554_p12, %p553_p11 }
  0x1f   :  { %p556_p0 = pnand %p555_p13, %p549_p10 }
  0x21   :  { %559 = shalt.err (!%p556_p0)
}
  0x22   :  { %51 = dma.hbm_to_vmem [thread:$0]  %s713_s3, 1024, %s46_s11, [#allocation6], %s609_s27, %s609_s27, %s610_s28  }
  0x23   :  { %s613_s17 = smov [#allocation8]  }
  0x24   :  { %s59_s18 = sshll.u32 %s613_s17, 4  ;;  %s60_s18 = int_to_ptr.vmem [resolvable:$true] %s59_s18 }
  0x25   :  { %s568_s19 = scalar_lea.vmem %s60_s18, 1024  ;;  %p573_p2 = scmp.lt.s32.totalorder %s60_s18, %s60_s18 }
  0x26   :  { %p569_p1 = scmp.ne.s32.totalorder %s60_s18, %s568_s19  ;;  %p574_p3 = scmp.lt.s32.totalorder %s568_s19, %s568_s19 }
  0x28   :  { %p575_p4 = por %p574_p3, %p573_p2 }
  0x2a   :  { %p576_p5 = pnand %p575_p4, %p569_p1 }
  0x2c   :  { %579 = shalt.err (!%p576_p5)
}
  0x2d   :  { %65 = dma.hbm_to_vmem [thread:$0]  %s715_s5, 1024, %s60_s18, [#allocation9], %s609_s27, %s609_s27, %s610_s28  }
  0x2e   :  { %600 = dma.done.wait [#allocation3], 128  }
  0x2f   :  { %601 = vsyncadd [#allocation3], 4294967168 }
  0x30   :  { %602 = dma.done.wait [#allocation6], 1152  }
  0x31   :  { %603 = vsyncadd [#allocation6], 4294966144 }
  0x32   :  { %604 = dma.done.wait [#allocation9], 1024  }
  0x33   :  { %605 = vsyncadd [#allocation9], 4294966272  ;;  %v614_v0 = vmov 0.0   ;;  %vm615_vm0 = vmmov 0   ;;  %v483_v1 = vld [vmem:[#allocation5] sm:$0xff]   ;;  %v81_v2 = vld [vmem:[#allocation2] sm:$0xff] }
  0x34   :  { %428 = vmatprep.subr.bf16.mxu0 %v614_v0  ;;  %430 = vmatprep.mubr.msk.bf16.mxu0 %vm615_vm0, %v614_v0  ;;  %v82_v3 = vpack.c.bf16 %v81_v2, %v81_v2  ;;  %vm98_vm1 = vcmask 130048   ;;  %v484_v4 = vld [vmem:[#allocation7 + $0x38] sm:$0xff]   ;;  %v485_v5 = vld [vmem:[#allocation7 + $0x30] sm:$0xff]   ;;  %v486_v6 = vld [vmem:[#allocation7 + $0x28] sm:$0xff]   ;;  %s616_s24 = smov [#allocation10]   ;;  %vm368_vm2 = vcmask 523264  }
  0x35   :  { %434 = vmatprep.subr.bf16.mxu1 %v614_v0  ;;  %450 = vmatprep.mubr.msk.bf16.mxu1 %vm615_vm0, %v614_v0  ;;  %v487_v7 = vld [vmem:[#allocation7 + $0x20] sm:$0xff]   ;;  %v488_v8 = vld [vmem:[#allocation7 + $0x18] sm:$0xff]   ;;  %v489_v9 = vld [vmem:[#allocation7 + $0x10] sm:$0xff]   ;;  %s376_s25 = sshll.u32 %s616_s24, 4  ;;  %s377_s25 = int_to_ptr.vmem [resolvable:$true] %s376_s25 }
  0x36   :  { %429 = vmatpush3.bf16.msra.mxu0 %v483_v1  ;;  %435 = vmatpush3.bf16.msra.mxu1 %v484_v4  ;;  %v490_v10 = vld [vmem:[#allocation7 + $0x8] sm:$0xff]   ;;  %v491_v11 = vld [vmem:[#allocation7] sm:$0xff]   ;;  %v492_v12 = vld [vmem:[#allocation8 + $0x38] sm:$0xff]   ;;  %p585_p7 = scmp.lt.s32.totalorder %s377_s25, %s377_s25 }
  0x37   :  { %454 = vmatprep.subr.bf16.mxu0 %v614_v0  ;;  %436 = vmatprep.subr.bf16.mxu1 %v614_v0  ;;  %v493_v13 = vld [vmem:[#allocation8 + $0x30] sm:$0xff]   ;;  %v494_v14 = vld [vmem:[#allocation8 + $0x28] sm:$0xff]   ;;  %v495_v15 = vld [vmem:[#allocation8 + $0x20] sm:$0xff]  }
  0x38   :  { %v496_v16 = vld [vmem:[#allocation8 + $0x18] sm:$0xff]   ;;  %v497_v17 = vld [vmem:[#allocation8 + $0x10] sm:$0xff]   ;;  %v498_v26 = vld [vmem:[#allocation8 + $0x8] sm:$0xff]  }
  0x39   :  { %431 = vmatmul.mubr.msk.bf16.vlgmr.msra.gmra.mxu0 %vm98_vm1, %v82_v3  ;;  %v387_v18 = vld [vmem:[%s712_s2] ss:$0 sm:$0xff]  ;;  %v499_v27 = vld [vmem:[#allocation8] sm:$0xff]  }
  0x3a   :  { %470 = vmatprep.mubr.msk.bf16.mxu0 %vm615_vm0, %v614_v0  ;;  %437 = vmatpush3.bf16.msra.mxu1 %v485_v5  ;;  %v390_v28 = vld [vmem:[%s714_s4] ss:$0 sm:$0xff]  ;;  %s580_s4 = scalar_lea.vmem %s377_s25, 128 }
  0x3b   :  { %438 = vmatprep.subr.bf16.mxu1 %v614_v0  ;;  %455 = vmatpush3.bf16.msra.mxu0 %v492_v12  ;;  %v399_v36 = vld [vmem:[%s716_s6] ss:$0 sm:$0xff]  ;;  %p581_p6 = scmp.ne.s32.totalorder %s377_s25, %s580_s4  ;;  %p586_p8 = scmp.lt.s32.totalorder %s580_s4, %s580_s4 }
  0x3c   :  { %456 = vmatprep.subr.bf16.mxu0 %v614_v0 }
  0x3d   :  { %p587_p9 = por %p586_p8, %p585_p7 }
  0x3e   :  { %439 = vmatpush3.bf16.msra.mxu1 %v486_v6 }
  0x3f   :  { %440 = vmatprep.subr.bf16.mxu1 %v614_v0  ;;  %457 = vmatpush3.bf16.msra.mxu0 %v493_v13  ;;  %p588_p10 = pnand %p587_p9, %p581_p6 }
  0x40   :  { %458 = vmatprep.subr.bf16.mxu0 %v614_v0 }
  0x42   :  { %441 = vmatpush3.bf16.msra.mxu1 %v487_v7 }
  0x43   :  { %442 = vmatprep.subr.bf16.mxu1 %v614_v0  ;;  %459 = vmatpush3.bf16.msra.mxu0 %v494_v14 }
  0x44   :  { %460 = vmatprep.subr.bf16.mxu0 %v614_v0 }
  0x46   :  { %443 = vmatpush3.bf16.msra.mxu1 %v488_v8 }
  0x47   :  { %444 = vmatprep.subr.bf16.mxu1 %v614_v0  ;;  %461 = vmatpush3.bf16.msra.mxu0 %v495_v15 }
  0x48   :  { %462 = vmatprep.subr.bf16.mxu0 %v614_v0 }
  0x4a   :  { %445 = vmatpush3.bf16.msra.mxu1 %v489_v9 }
  0x4b   :  { %446 = vmatprep.subr.bf16.mxu1 %v614_v0  ;;  %463 = vmatpush3.bf16.msra.mxu0 %v496_v16 }
  0x4c   :  { %464 = vmatprep.subr.bf16.mxu0 %v614_v0 }
  0x4e   :  { %447 = vmatpush3.bf16.msra.mxu1 %v490_v10 }
  0x4f   :  { %448 = vmatprep.subr.bf16.mxu1 %v614_v0  ;;  %465 = vmatpush3.bf16.msra.mxu0 %v497_v17 }
  0x50   :  { %466 = vmatprep.subr.bf16.mxu0 %v614_v0 }
  0x52   :  { %449 = vmatpush3.bf16.msra.mxu1 %v491_v11 }
  0x53   :  { %467 = vmatpush3.bf16.msra.mxu0 %v498_v26 }
  0x54   :  { %468 = vmatprep.subr.bf16.mxu0 %v614_v0 }
  0x57   :  { %469 = vmatpush3.bf16.msra.mxu0 %v499_v27 }
  0xf9   :  { %v136_v19 = vpop.f32.mrf.mxu0 }
  0xfa   :  { %v137_v20 = vadd.f32 %v387_v18, %v136_v19 }
  0xfb   :  { %v432_v21 = vpop.f32.mrf.mxu0 }
  0xfc   :  { %v142_v22 = vmax.f32 %v137_v20, 0.0 }
  0xfd   :  { %v139_v23 = vpop.f32.mrf.mxu0 }
  0xfe   :  { %v143_v24 = vpack.c.bf16 %v142_v22, %v142_v22 }
  0xff   :  { %v433_v25 = vpop.f32.mrf.mxu0 }
 0x100   :  { %451 = vmatmul.mubr.bf16.vlgmr.msra.gmra.mxu1 %v143_v24 }
 0x1c0   :  { %v249_v29 = vpop.f32.mrf.mxu1 }
 0x1c1   :  { %v250_v30 = vadd.f32 %v390_v28, %v249_v29 }
 0x1c2   :  { %v452_v31 = vpop.f32.mrf.mxu1 }
 0x1c3   :  { %v255_v32 = vmax.f32 %v250_v30, 0.0 }
 0x1c4   :  { %v252_v33 = vpop.f32.mrf.mxu1 }
 0x1c5   :  { %v256_v34 = vpack.c.bf16 %v255_v32, %v255_v32 }
 0x1c6   :  { %v453_v35 = vpop.f32.mrf.mxu1 }
 0x1c7   :  { %471 = vmatmul.mubr.bf16.vlgmr.msra.gmra.mxu0 %v256_v34 }
 0x287   :  { %v362_v37 = vpop.f32.mrf.mxu0 }
 0x288   :  { %v363_v38 = vadd.f32 %v399_v36, %v362_v37 }
 0x289   :  { %v472_v39 = vpop.f32.mrf.mxu0 }
 0x28a   :  { %369 = vst.msk [vmem:[#allocation10] sm:$0xff] %vm368_vm2, %v363_v38 }
 0x28b   :  { %v365_v40 = vpop.f32.mrf.mxu0 }
 0x28c   :  { %591 = shalt.err (!%p588_p10)
}
 0x28d   :  { %379 = dma.vmem_to_hbm [thread:$0]  %s377_s25, 128, %s717_s7, [#allocation4]   ;;  %v473_v41 = vpop.f32.mrf.mxu0 }
 0x28e   :  { %606 = dma.done.wait [#allocation4], 128  }
 0x28f   :  { %607 = vsyncadd [#allocation4], 4294967168 }
 0x290   :  { %383 = vsyncpa [#allocation3], 1 }
 0x291   :  { %384 = vsyncpa [#allocation6], 1 }
 0x292   :  { %385 = vsyncpa [#allocation9], 1 }
 0x293   :  { %386 = vsyncpa [#allocation4], 1 }

</bundles_post_ra>
